<compile_context>
chip_gen: v7x
topology: tpu7x:2x2x1
jax: 0.10.0
libtpu: 0.0.40
codegen_flags: <defaults>
</compile_context>

<pallas_src>
import jax
import jax.numpy as jnp
from jax.experimental import pallas as pl
from jax.experimental.pallas import tpu as pltpu

_NEG_PAD = -1.0e4  # BCE(-1e4, 0) == 0 exactly in f32 (exp underflows to 0).


def _bce_with_logits(x, y):
    # numerically stable nn.BCEWithLogitsLoss(reduction='none'):
    #   max(x, 0) - x*y + log(1 + exp(-|x|))
    return jnp.maximum(x, 0.0) - x * y + jnp.log1p(jnp.exp(-jnp.abs(x)))


def _round_up(x, m):
    return (x + m - 1) // m * m


def _pick_row_tile(rows, cols, target_block_bytes=2 * 1024 * 1024):
    """Row tile (multiple of 8) targeting ~target bytes per f32 stream.
    Prefers tiles that divide `rows` so the big span tensor needs no pad copy."""
    rows8 = _round_up(rows, 8)
    cap = (target_block_bytes // (cols * 4)) // 8 * 8
    cap = max(8, min(cap, rows8))
    if rows % 8 == 0:
        for tr in range(cap, 7, -8):
            if rows % tr == 0:
                return tr, rows
    return cap, _round_up(rows, cap)


def _compiler_params(per_step_bytes):
    # Explicit VMEM budget: double-buffered streams + scratch, with headroom,
    # capped so the same tiling is valid on v7x (64 MiB physical VMEM).
    vmem = int(min(64 * 1024 * 1024, max(32 * 1024 * 1024, 2 * per_step_bytes)))
    return pltpu.CompilerParams(dimension_semantics=("arbitrary",),
                                vmem_limit_bytes=vmem)


# ---------------------------------------------------------------------------
# Kernel 1: fused start+end masked BCE over lane-dense (rows, S*L) streams.
#   Accumulates weighted BCE and the repeated mask into (8, C) VMEM scratches
#   (VPU adds only); one cross-lane reduce + scalar store in the epilogue.
# ---------------------------------------------------------------------------
def _pair_masked_bce_kernel(xs_ref, ys_ref, xe_ref, ye_ref, m_ref,
                            num_ref, msum_ref, acc_b, acc_m):
    i = pl.program_id(0)

    @pl.when(i == 0)
    def _():
        acc_b[...] = jnp.zeros_like(acc_b)
        acc_m[...] = jnp.zeros_like(acc_m)

    m = m_ref[...].astype(jnp.float32)                       # (TR, C)
    bce = _bce_with_logits(xs_ref[...].astype(jnp.float32),
                           ys_ref[...].astype(jnp.float32))
    bce = bce + _bce_with_logits(xe_ref[...].astype(jnp.float32),
                                 ye_ref[...].astype(jnp.float32))
    w = bce * m
    tr, c = w.shape
    acc_b[...] = acc_b[...] + w.reshape(tr // 8, 8, c).sum(axis=0)
    acc_m[...] = acc_m[...] + m.reshape(tr // 8, 8, c).sum(axis=0)

    @pl.when(i == pl.num_programs(0) - 1)
    def _():
        num_ref[...] = jnp.sum(acc_b[...]).reshape(1, 1)
        msum_ref[...] = jnp.sum(acc_m[...]).reshape(1, 1)


def _pair_masked_bce_sums(start_logits, end_logits, start_labels, end_labels,
                          mask_f32):
    B, S, L = start_logits.shape
    C = S * L
    xs = start_logits.reshape(B, C)
    xe = end_logits.reshape(B, C)
    ys = start_labels.reshape(B, C)
    ye = end_labels.reshape(B, C)
    m = jnp.broadcast_to(mask_f32[:, :, None], (B, S, L)).reshape(B, C)

    tr, rp = _pick_row_tile(B, C)
    if rp != B:
        pad = ((0, rp - B), (0, 0))
        xs = jnp.pad(xs, pad)
        xe = jnp.pad(xe, pad)
        ys = jnp.pad(ys, pad)
        ye = jnp.pad(ye, pad)
        m = jnp.pad(m, pad)            # mask 0 => padded rows contribute 0

    per_step = 5 * 2 * tr * C * 4 + 2 * 8 * C * 4
    spec = pl.BlockSpec((tr, C), lambda i: (i, 0))
    num, msum = pl.pallas_call(
        _pair_masked_bce_kernel,
        out_shape=(jax.ShapeDtypeStruct((1, 1), jnp.float32),
                   jax.ShapeDtypeStruct((1, 1), jnp.float32)),
        grid=(rp // tr,),
        in_specs=[spec, spec, spec, spec, spec],
        out_specs=(pl.BlockSpec((1, 1), lambda i: (0, 0)),
                   pl.BlockSpec((1, 1), lambda i: (0, 0))),
        scratch_shapes=[pltpu.VMEM((8, C), jnp.float32),
                        pltpu.VMEM((8, C), jnp.float32)],
        compiler_params=_compiler_params(per_step),
    )(xs, ys, xe, ye, m)
    return num[0, 0], msum[0, 0]


# ---------------------------------------------------------------------------
# Kernel 2: un-masked BCE sum over a lane-dense 2-D stream (span numerator).
# ---------------------------------------------------------------------------
def _bce_sum_kernel(x_ref, y_ref, out_ref, acc):
    i = pl.program_id(0)

    @pl.when(i == 0)
    def _():
        acc[...] = jnp.zeros_like(acc)

    b = _bce_with_logits(x_ref[...].astype(jnp.float32),
                         y_ref[...].astype(jnp.float32))
    tr, c = b.shape
    acc[...] = acc[...] + b.reshape(tr // 8, 8, c).sum(axis=0)

    @pl.when(i == pl.num_programs(0) - 1)
    def _():
        out_ref[...] = jnp.sum(acc[...]).reshape(1, 1)


def _bce_sum_2d(x, y):
    R, C = x.shape
    tr, rp = _pick_row_tile(R, C)
    if rp != R:
        x = jnp.pad(x, ((0, rp - R), (0, 0)), constant_values=_NEG_PAD)
        y = jnp.pad(y, ((0, rp - R), (0, 0)))
    per_step = 2 * 2 * tr * C * 4 + 8 * C * 4
    spec = pl.BlockSpec((tr, C), lambda i: (i, 0))
    out = pl.pallas_call(
        _bce_sum_kernel,
        out_shape=jax.ShapeDtypeStruct((1, 1), jnp.float32),
        grid=(rp // tr,),
        in_specs=[spec, spec],
        out_specs=pl.BlockSpec((1, 1), lambda i: (0, 0)),
        scratch_shapes=[pltpu.VMEM((8, C), jnp.float32)],
        compiler_params=_compiler_params(per_step),
    )(x, y)
    return out[0, 0]


# ---------------------------------------------------------------------------
# Kernel 3: span-candidate count (denominator of the span loss).
#   count_b = sum_{i<=j,l} m_i m_j [ (sp_i & ep_j) | (sl_i & el_j) ]
#   via inclusion-exclusion over the label axis; the mask is folded into the
#   thresholded operands and triu is a hoisted resident constant.
# ---------------------------------------------------------------------------
def _span_count_kernel(triu_ref, sx_ref, ex_ref, sy_ref, ey_ref, m_ref,
                       cnt_ref):
    b = pl.program_id(0)

    @pl.when(b == 0)
    def _():
        cnt_ref[...] = jnp.zeros_like(cnt_ref)

    m = (m_ref[0].astype(jnp.float32) != 0.0).astype(jnp.float32)       # (S, 1)
    sp = (sx_ref[0].astype(jnp.float32) > 0.0).astype(jnp.float32) * m   # (S, L)
    ep = (ex_ref[0].astype(jnp.float32) > 0.0).astype(jnp.float32) * m
    sl = (sy_ref[0].astype(jnp.float32) != 0.0).astype(jnp.float32) * m
    el = (ey_ref[0].astype(jnp.float32) != 0.0).astype(jnp.float32) * m

    P = jnp.einsum('il,jl->ij', sp, ep, preferred_element_type=jnp.float32)
    G = jnp.einsum('il,jl->ij', sl, el, preferred_element_type=jnp.float32)
    Q = jnp.einsum('il,jl->ij', sp * sl, ep * el,
                   preferred_element_type=jnp.float32)

    cnt_ref[...] = cnt_ref[...] + jnp.sum(triu_ref[...] * (P + G - Q))


def _span_count(start_logits, end_logits, start_labels, end_labels, masks):
    B, S, L = start_logits.shape
    triu = jnp.triu(jnp.ones((S, S), jnp.float32))      # built once, resident
    m3 = masks.astype(jnp.float32).reshape(B, S, 1)
    sel = pl.BlockSpec((1, S, L), lambda b: (b, 0, 0))
    cnt = pl.pallas_call(
        _span_count_kernel,
        out_shape=jax.ShapeDtypeStruct((1, 1), jnp.float32),
        grid=(B,),
        in_specs=[pl.BlockSpec((S, S), lambda b: (0, 0)),   # constant across b
                  sel, sel, sel, sel,
                  pl.BlockSpec((1, S, 1), lambda b: (b, 0, 0))],
        out_specs=pl.BlockSpec((1, 1), lambda b: (0, 0)),
        compiler_params=pltpu.CompilerParams(
            dimension_semantics=("arbitrary",)),
    )(triu, start_logits, end_logits, start_labels, end_labels, m3)
    return cnt[0, 0]


# ---------------------------------------------------------------------------
# Public wrapper: mirrors SpanLossForMultiLabel.forward(preds, target, masks,
# nested) exactly.
# ---------------------------------------------------------------------------
def span_loss_for_multilabel(preds, target, masks, nested=False):
    if not nested:
        # flated_forward: masked row-wise BCE sums, averaged over active rows.
        start_logits, end_logits = preds
        start_labels, end_labels = target
        B, S, L = start_logits.shape
        m = (masks.reshape(B, S) == 1).astype(jnp.float32)
        num, msum = _pair_masked_bce_sums(start_logits, end_logits,
                                          start_labels, end_labels, m)
        return num / (msum / L)            # msum == L * (#active rows)

    start_logits, end_logits, span_logits = preds
    start_labels, end_labels, span_labels = target
    B, S, L = start_logits.shape
    m = masks.astype(jnp.float32).reshape(B, S)

    num, msum = _pair_masked_bce_sums(start_logits, end_logits,
                                      start_labels, end_labels, m)
    se_loss = num / (msum / L)             # == start_num/mask.sum() + end_num/mask.sum()

    span_num = _bce_sum_2d(span_logits.reshape(B * S, S * L),
                           span_labels.reshape(B * S, S * L))
    cnt = _span_count(start_logits, end_logits, start_labels, end_labels, masks)
    span_loss = span_num / (cnt / L)
    return se_loss + span_loss


# ---------------------------------------------------------------------------
# Pure-JAX references (direct transcription of the torch code) for checking.
# ---------------------------------------------------------------------------
def _reference_nested(preds, target, masks):
    start_logits, end_logits, span_logits = preds
    start_labels, end_labels, span_labels = target
    B, S, L = start_logits.shape
    m = masks.astype(jnp.float32)
    me = m[:, :, None]
    start_loss = jnp.sum(_bce_with_logits(
        start_logits, start_labels.astype(jnp.float32)) * me) / jnp.sum(m)
    end_loss = jnp.sum(_bce_with_logits(
        end_logits, end_labels.astype(jnp.float32)) * me) / jnp.sum(m)
    sp = start_logits > 0
    ep = end_logits > 0
    sl = start_labels != 0
    el = end_labels != 0
    cand = (sp[:, :, None, :] & ep[:, None, :, :]) | \
           (sl[:, :, None, :] & el[:, None, :, :])
    mb = masks != 0
    mm = mb[:, :, None] & mb[:, None, :]
    triu = jnp.triu(jnp.ones((S, S), bool))
    span_masks = mm[..., None] & triu[None, :, :, None] & cand
    span_num = jnp.sum(_bce_with_logits(span_logits,
                                        span_labels.astype(jnp.float32)))
    span_loss = span_num / (jnp.sum(span_masks.astype(jnp.float32)) / L)
    return start_loss + end_loss + span_loss


def _reference_flated(preds, target, masks):
    start_logits, end_logits = preds
    start_labels, end_labels = target
    L = start_logits.shape[-1]
    active = (masks.reshape(-1) == 1).astype(jnp.float32)
    cnt = jnp.sum(active)
    s = jnp.sum(_bce_with_logits(
        start_logits.reshape(-1, L),
        start_labels.reshape(-1, L).astype(jnp.float32)).sum(-1) * active)
    e = jnp.sum(_bce_with_logits(
        end_logits.reshape(-1, L),
        end_labels.reshape(-1, L).astype(jnp.float32)).sum(-1) * active)
    return s / cnt + e / cnt


if __name__ == "__main__":
    key = jax.random.PRNGKey(0)
    B, S, L = 2, 8, 4
    ks = jax.random.split(key, 7)

    start_logits = jax.random.normal(ks[0], (B, S, L), jnp.float32)
    end_logits = jax.random.normal(ks[1], (B, S, L), jnp.float32)
    span_logits = jax.random.normal(ks[2], (B, S, S, L), jnp.float32)
    start_labels = (jax.random.uniform(ks[3], (B, S, L)) > 0.7).astype(jnp.float32)
    end_labels = (jax.random.uniform(ks[4], (B, S, L)) > 0.7).astype(jnp.float32)
    span_labels = (jax.random.uniform(ks[5], (B, S, S, L)) > 0.9).astype(jnp.float32)
    masks = (jax.random.uniform(ks[6], (B, S)) > 0.25).astype(jnp.float32)
    masks = masks.at[:, 0].set(1.0)   # guarantee at least one active token

    loss_nested = span_loss_for_multilabel(
        (start_logits, end_logits, span_logits),
        (start_labels, end_labels, span_labels),
        masks, nested=True)
    loss_flat = span_loss_for_multilabel(
        (start_logits, end_logits),
        (start_labels, end_labels),
        masks, nested=False)
    jax.block_until_ready((loss_nested, loss_flat))

    ref_nested = _reference_nested(
        (start_logits, end_logits, span_logits),
        (start_labels, end_labels, span_labels), masks)
    ref_flat = _reference_flated(
        (start_logits, end_logits), (start_labels, end_labels), masks)

    assert jnp.allclose(loss_nested, ref_nested, rtol=1e-5, atol=1e-5), \
        (loss_nested, ref_nested)
    assert jnp.allclose(loss_flat, ref_flat, rtol=1e-5, atol=1e-5), \
        (loss_flat, ref_flat)

    print("KERNEL_OK")
</pallas_src>

<mosaic_0001>
module attributes {stable_mosaic.version = 11 : i64} {
  func.func @_pair_masked_bce_kernel(%arg0: i32, %arg1: memref<8x32xf32, #tpu.memory_space<vmem>>, %arg2: memref<8x32xf32, #tpu.memory_space<vmem>>, %arg3: memref<8x32xf32, #tpu.memory_space<vmem>>, %arg4: memref<8x32xf32, #tpu.memory_space<vmem>>, %arg5: memref<8x32xf32, #tpu.memory_space<vmem>>, %arg6: memref<1x1xf32, #tpu.memory_space<vmem>>, %arg7: memref<1x1xf32, #tpu.memory_space<vmem>>, %arg8: memref<8x32xf32, #tpu.memory_space<vmem>>, %arg9: memref<8x32xf32, #tpu.memory_space<vmem>>) attributes {dimension_semantics = [#tpu.dimension_semantics<arbitrary>], iteration_bounds = array<i64: 1>, scalar_prefetch = 0 : i64, scratch_operands = 2 : i64, tpu.core_type = #tpu.core_type<tc>, window_params = [{transform_indices = @transform_0, window_bounds = array<i64: 8, 32>}, {transform_indices = @transform_1, window_bounds = array<i64: 8, 32>}, {transform_indices = @transform_2, window_bounds = array<i64: 8, 32>}, {transform_indices = @transform_3, window_bounds = array<i64: 8, 32>}, {transform_indices = @transform_4, window_bounds = array<i64: 8, 32>}, {pipeline_mode = #tpu.pipeline_mode<synchronous>, transform_indices = @transform_5, window_bounds = array<i64: 1, 1>}, {pipeline_mode = #tpu.pipeline_mode<synchronous>, transform_indices = @transform_6, window_bounds = array<i64: 1, 1>}]} {
    %c0_i32 = arith.constant 0 : i32
    %0 = arith.cmpi eq, %arg0, %c0_i32 : i32
    %1 = arith.extui %0 : i1 to i32
    %c0_i32_0 = arith.constant 0 : i32
    %2 = arith.cmpi ne, %1, %c0_i32_0 : i32
    scf.if %2 {
      %cst_25 = arith.constant 0.000000e+00 : f32
      %43 = vector.broadcast %cst_25 : f32 to vector<8x32xf32>
      %c0_26 = arith.constant 0 : index
      %c0_27 = arith.constant 0 : index
      %44 = vector.load %arg8[%c0_26, %c0_27] : memref<8x32xf32, #tpu.memory_space<vmem>>, vector<8x32xf32>
      tpu.vector_store %arg8[%c0_26, %c0_27], %43 {strides = array<i32>} : memref<8x32xf32, #tpu.memory_space<vmem>>, vector<8x32xf32>,
      %cst_28 = arith.constant 0.000000e+00 : f32
      %45 = vector.broadcast %cst_28 : f32 to vector<8x32xf32>
      %c0_29 = arith.constant 0 : index
      %c0_30 = arith.constant 0 : index
      %46 = vector.load %arg9[%c0_29, %c0_30] : memref<8x32xf32, #tpu.memory_space<vmem>>, vector<8x32xf32>
      tpu.vector_store %arg9[%c0_29, %c0_30], %45 {strides = array<i32>} : memref<8x32xf32, #tpu.memory_space<vmem>>, vector<8x32xf32>,
    } else {
    }
    %c0 = arith.constant 0 : index
    %c0_1 = arith.constant 0 : index
    %3 = vector.load %arg5[%c0, %c0_1] : memref<8x32xf32, #tpu.memory_space<vmem>>, vector<8x32xf32>
    %c0_2 = arith.constant 0 : index
    %c0_3 = arith.constant 0 : index
    %4 = vector.load %arg1[%c0_2, %c0_3] : memref<8x32xf32, #tpu.memory_space<vmem>>, vector<8x32xf32>
    %c0_4 = arith.constant 0 : index
    %c0_5 = arith.constant 0 : index
    %5 = vector.load %arg2[%c0_4, %c0_5] : memref<8x32xf32, #tpu.memory_space<vmem>>, vector<8x32xf32>
    %cst = arith.constant 0.000000e+00 : f32
    %6 = vector.broadcast %cst : f32 to vector<8x32xf32>
    %7 = arith.maximumf %4, %6 : vector<8x32xf32>
    %8 = arith.mulf %4, %5 : vector<8x32xf32>
    %9 = arith.subf %7, %8 : vector<8x32xf32>
    %10 = math.absf %4 : vector<8x32xf32>
    %cst_6 = arith.constant 0.000000e+00 : f32
    %11 = vector.broadcast %cst_6 : f32 to vector<8x32xf32>
    %12 = arith.subf %11, %10 : vector<8x32xf32>
    %13 = math.exp %12 : vector<8x32xf32>
    %14 = math.log1p %13 : vector<8x32xf32>
    %15 = arith.addf %9, %14 : vector<8x32xf32>
    %c0_7 = arith.constant 0 : index
    %c0_8 = arith.constant 0 : index
    %16 = vector.load %arg3[%c0_7, %c0_8] : memref<8x32xf32, #tpu.memory_space<vmem>>, vector<8x32xf32>
    %c0_9 = arith.constant 0 : index
    %c0_10 = arith.constant 0 : index
    %17 = vector.load %arg4[%c0_9, %c0_10] : memref<8x32xf32, #tpu.memory_space<vmem>>, vector<8x32xf32>
    %cst_11 = arith.constant 0.000000e+00 : f32
    %18 = vector.broadcast %cst_11 : f32 to vector<8x32xf32>
    %19 = arith.maximumf %16, %18 : vector<8x32xf32>
    %20 = arith.mulf %16, %17 : vector<8x32xf32>
    %21 = arith.subf %19, %20 : vector<8x32xf32>
    %22 = math.absf %16 : vector<8x32xf32>
    %cst_12 = arith.constant 0.000000e+00 : f32
    %23 = vector.broadcast %cst_12 : f32 to vector<8x32xf32>
    %24 = arith.subf %23, %22 : vector<8x32xf32>
    %25 = math.exp %24 : vector<8x32xf32>
    %26 = math.log1p %25 : vector<8x32xf32>
    %27 = arith.addf %21, %26 : vector<8x32xf32>
    %28 = arith.addf %15, %27 : vector<8x32xf32>
    %29 = arith.mulf %28, %3 : vector<8x32xf32>
    %c0_13 = arith.constant 0 : index
    %c0_14 = arith.constant 0 : index
    %30 = vector.load %arg8[%c0_13, %c0_14] : memref<8x32xf32, #tpu.memory_space<vmem>>, vector<8x32xf32>
    %31 = vector.shape_cast %29 : vector<8x32xf32> to vector<1x8x32xf32>
    %cst_15 = arith.constant dense<0.000000e+00> : vector<8x32xf32>
    %32 = vector.multi_reduction <add>, %31, %cst_15 [0] : vector<1x8x32xf32> to vector<8x32xf32>
    %33 = arith.addf %30, %32 : vector<8x32xf32>
    %c0_16 = arith.constant 0 : index
    %c0_17 = arith.constant 0 : index
    %34 = vector.load %arg8[%c0_16, %c0_17] : memref<8x32xf32, #tpu.memory_space<vmem>>, vector<8x32xf32>
    tpu.vector_store %arg8[%c0_16, %c0_17], %33 {strides = array<i32>} : memref<8x32xf32, #tpu.memory_space<vmem>>, vector<8x32xf32>,
    %c0_18 = arith.constant 0 : index
    %c0_19 = arith.constant 0 : index
    %35 = vector.load %arg9[%c0_18, %c0_19] : memref<8x32xf32, #tpu.memory_space<vmem>>, vector<8x32xf32>
    %36 = vector.shape_cast %3 : vector<8x32xf32> to vector<1x8x32xf32>
    %cst_20 = arith.constant dense<0.000000e+00> : vector<8x32xf32>
    %37 = vector.multi_reduction <add>, %36, %cst_20 [0] : vector<1x8x32xf32> to vector<8x32xf32>
    %38 = arith.addf %35, %37 : vector<8x32xf32>
    %c0_21 = arith.constant 0 : index
    %c0_22 = arith.constant 0 : index
    %39 = vector.load %arg9[%c0_21, %c0_22] : memref<8x32xf32, #tpu.memory_space<vmem>>, vector<8x32xf32>
    tpu.vector_store %arg9[%c0_21, %c0_22], %38 {strides = array<i32>} : memref<8x32xf32, #tpu.memory_space<vmem>>, vector<8x32xf32>,
    %c0_i32_23 = arith.constant 0 : i32
    %40 = arith.cmpi eq, %arg0, %c0_i32_23 : i32
    %41 = arith.extui %40 : i1 to i32
    %c0_i32_24 = arith.constant 0 : i32
    %42 = arith.cmpi ne, %41, %c0_i32_24 : i32
    scf.if %42 {
      %c0_25 = arith.constant 0 : index
      %c0_26 = arith.constant 0 : index
      %43 = vector.load %arg8[%c0_25, %c0_26] : memref<8x32xf32, #tpu.memory_space<vmem>>, vector<8x32xf32>
      %44 = vector.shape_cast %43 : vector<8x32xf32> to vector<1x8x32xf32>
      %cst_27 = arith.constant dense<0.000000e+00> : vector<1xf32>
      %45 = vector.multi_reduction <add>, %44, %cst_27 [1, 2] : vector<1x8x32xf32> to vector<1xf32>
      %46 = vector.shape_cast %45 : vector<1xf32> to vector<1x1x1xf32>
      %47 = vector.extract %46[0, 0, 0] : f32 from vector<1x1x1xf32>
      %48 = vector.broadcast %47 : f32 to vector<1x1xf32>
      %c0_28 = arith.constant 0 : index
      %c0_29 = arith.constant 0 : index
      %49 = vector.load %arg6[%c0_28, %c0_29] : memref<1x1xf32, #tpu.memory_space<vmem>>, vector<1x1xf32>
      tpu.vector_store %arg6[%c0_28, %c0_29], %48 {strides = array<i32>} : memref<1x1xf32, #tpu.memory_space<vmem>>, vector<1x1xf32>,
      %c0_30 = arith.constant 0 : index
      %c0_31 = arith.constant 0 : index
      %50 = vector.load %arg9[%c0_30, %c0_31] : memref<8x32xf32, #tpu.memory_space<vmem>>, vector<8x32xf32>
      %51 = vector.shape_cast %50 : vector<8x32xf32> to vector<1x8x32xf32>
      %cst_32 = arith.constant dense<0.000000e+00> : vector<1xf32>
      %52 = vector.multi_reduction <add>, %51, %cst_32 [1, 2] : vector<1x8x32xf32> to vector<1xf32>
      %53 = vector.shape_cast %52 : vector<1xf32> to vector<1x1x1xf32>
      %54 = vector.extract %53[0, 0, 0] : f32 from vector<1x1x1xf32>
      %55 = vector.broadcast %54 : f32 to vector<1x1xf32>
      %c0_33 = arith.constant 0 : index
      %c0_34 = arith.constant 0 : index
      %56 = vector.load %arg7[%c0_33, %c0_34] : memref<1x1xf32, #tpu.memory_space<vmem>>, vector<1x1xf32>
      tpu.vector_store %arg7[%c0_33, %c0_34], %55 {strides = array<i32>} : memref<1x1xf32, #tpu.memory_space<vmem>>, vector<1x1xf32>,
    } else {
    }
    return
  }
  func.func @transform_0(%arg0: i32) -> (i32, i32) {
    %c0_i32 = arith.constant 0 : i32
    %c0_i32_0 = arith.constant 0 : i32
    return %arg0, %c0_i32 : i32, i32
  }
  func.func @transform_1(%arg0: i32) -> (i32, i32) {
    %c0_i32 = arith.constant 0 : i32
    %c0_i32_0 = arith.constant 0 : i32
    return %arg0, %c0_i32 : i32, i32
  }
  func.func @transform_2(%arg0: i32) -> (i32, i32) {
    %c0_i32 = arith.constant 0 : i32
    %c0_i32_0 = arith.constant 0 : i32
    return %arg0, %c0_i32 : i32, i32
  }
  func.func @transform_3(%arg0: i32) -> (i32, i32) {
    %c0_i32 = arith.constant 0 : i32
    %c0_i32_0 = arith.constant 0 : i32
    return %arg0, %c0_i32 : i32, i32
  }
  func.func @transform_4(%arg0: i32) -> (i32, i32) {
    %c0_i32 = arith.constant 0 : i32
    %c0_i32_0 = arith.constant 0 : i32
    return %arg0, %c0_i32 : i32, i32
  }
  func.func @transform_5(%arg0: i32) -> (i32, i32) {
    %c0_i32 = arith.constant 0 : i32
    %c0_i32_0 = arith.constant 0 : i32
    %c0_i32_1 = arith.constant 0 : i32
    return %c0_i32, %c0_i32_0 : i32, i32
  }
  func.func @transform_6(%arg0: i32) -> (i32, i32) {
    %c0_i32 = arith.constant 0 : i32
    %c0_i32_0 = arith.constant 0 : i32
    %c0_i32_1 = arith.constant 0 : i32
    return %c0_i32, %c0_i32_0 : i32, i32
  }
}

</mosaic_0001>

<bundles_post_ra>
// kernel: tpu_custom_call.1
= control target key start
LH: loop header
LB: loop body
LE: loop exit
PB: predicated region body
PF: predicated region fallthrough
CT: control target
= control target key end

     0   :  { %12 = vsyncpa [#allocation5], 0  ;;  %s475_s0 = inlined_call_operand.hbm [shape: f32[8,32], index: 0, kind: input, shape index: {}]   ;;  %s476_s1 = inlined_call_operand.hbm [shape: f32[8,32], index: 1, kind: input, shape index: {}]   ;;  %s477_s2 = inlined_call_operand.hbm [shape: f32[8,32], index: 2, kind: input, shape index: {}]   ;;  %s478_s3 = inlined_call_operand.vmem [shape: f32[8,32], index: 3, kind: input, shape index: {}]   ;;  %s479_s4 = inlined_call_operand.hbm [shape: f32[8,32], index: 4, kind: input, shape index: {}]   ;;  %s480_s5 = inlined_call_operand.hbm [shape: f32[1,1], index: 5, kind: output, shape index: {0}]   ;;  %s481_s6 = inlined_call_operand.hbm [shape: f32[1,1], index: 6, kind: output, shape index: {1}]  }
   0x1   :  { %13 = vsyncpa [#allocation8], 0 }
   0x2   :  { %14 = vsyncpa [#allocation11], 0 }
   0x3   :  { %15 = vsyncpa [#allocation6], 0 }
   0x4   :  { %16 = vsyncpa [#allocation14], 0  ;;  %s350_s21 = smov [#allocation7]   ;;  %s351_s23 = smov [#allocation4]  }
   0x5   :  { %s33_s22 = sshll.u32 %s350_s21, 4  ;;  %s23_s24 = sshll.u32 %s351_s23, 4  ;;  %s34_s22 = int_to_ptr.vmem [resolvable:$true] %s33_s22  ;;  %s24_s24 = int_to_ptr.vmem [resolvable:$true] %s23_s24 }
   0x6   :  { %s208_s27 = scalar_lea.hbm %s476_s1, 128 }
   0x7   :  { %p209_p0 = scmp.ne.s32.totalorder %s476_s1, %s208_s27  ;;  %p212_p1 = scmp.lt.u32.totalorder %s208_s27, %s476_s1 }
   0x9   :  { %p214_p2 = pnand %p212_p1, %p209_p0 }
   0xb   :  { %217 = shalt.err (!%p214_p2)
}
   0xc   :  { %s218_s8 = scalar_lea.vmem %s34_s22, 128  ;;  %p223_p4 = scmp.lt.s32.totalorder %s34_s22, %s34_s22 }
   0xd   :  { %p219_p3 = scmp.ne.s32.totalorder %s34_s22, %s218_s8  ;;  %p224_p5 = scmp.lt.s32.totalorder %s218_s8, %s218_s8 }
   0xf   :  { %p225_p6 = por %p224_p5, %p223_p4 }
  0x11   :  { %p226_p7 = pnand %p225_p6, %p219_p3 }
  0x13   :  { %229 = shalt.err (!%p226_p7)
}
  0x14   :  { %36 = dma.hbm_to_vmem [thread:$0]  %s476_s1, 128, %s34_s22, [#allocation8]  }
  0x15   :  { %s230_s13 = scalar_lea.hbm %s475_s0, 128 }
  0x16   :  { %p231_p8 = scmp.ne.s32.totalorder %s475_s0, %s230_s13  ;;  %p234_p9 = scmp.lt.u32.totalorder %s230_s13, %s475_s0 }
  0x18   :  { %p236_p10 = pnand %p234_p9, %p231_p8 }
  0x1a   :  { %239 = shalt.err (!%p236_p10)
}
  0x1b   :  { %s240_s18 = scalar_lea.vmem %s24_s24, 128  ;;  %p245_p12 = scmp.lt.s32.totalorder %s24_s24, %s24_s24 }
  0x1c   :  { %p241_p11 = scmp.ne.s32.totalorder %s24_s24, %s240_s18  ;;  %p246_p13 = scmp.lt.s32.totalorder %s240_s18, %s240_s18 }
  0x1e   :  { %p247_p0 = por %p246_p13, %p245_p12 }
  0x20   :  { %p248_p1 = pnand %p247_p0, %p241_p11 }
  0x22   :  { %251 = shalt.err (!%p248_p1)
}
  0x23   :  { %26 = dma.hbm_to_vmem [thread:$0]  %s475_s0, 128, %s24_s24, [#allocation5]  }
  0x24   :  { %s352_s20 = smov [#allocation9]   ;;  %s353_s22 = smov [#allocation10]  }
  0x25   :  { %s43_s21 = sshll.u32 %s352_s20, 4  ;;  %s55_s23 = sshll.u32 %s353_s22, 4  ;;  %s44_s21 = int_to_ptr.vmem [resolvable:$true] %s43_s21  ;;  %s56_s23 = int_to_ptr.vmem [resolvable:$true] %s55_s23 }
  0x26   :  { %s252_s27 = scalar_lea.hbm %s477_s2, 128 }
  0x27   :  { %p253_p2 = scmp.ne.s32.totalorder %s477_s2, %s252_s27  ;;  %p256_p3 = scmp.lt.u32.totalorder %s252_s27, %s477_s2 }
  0x29   :  { %p258_p4 = pnand %p256_p3, %p253_p2 }
  0x2b   :  { %261 = shalt.err (!%p258_p4)
}
  0x2c   :  { %s262_s0 = scalar_lea.vmem %s44_s21, 128  ;;  %p267_p6 = scmp.lt.s32.totalorder %s44_s21, %s44_s21 }
  0x2d   :  { %p263_p5 = scmp.ne.s32.totalorder %s44_s21, %s262_s0  ;;  %p268_p7 = scmp.lt.s32.totalorder %s262_s0, %s262_s0 }
  0x2f   :  { %p269_p8 = por %p268_p7, %p267_p6 }
  0x31   :  { %p270_p9 = pnand %p269_p8, %p263_p5 }
  0x33   :  { %273 = shalt.err (!%p270_p9)
}
  0x34   :  { %46 = dma.hbm_to_vmem [thread:$0]  %s477_s2, 128, %s44_s21, [#allocation8]  }
  0x35   :  { %s274_s11 = scalar_lea.hbm %s479_s4, 128 }
  0x36   :  { %p275_p10 = scmp.ne.s32.totalorder %s479_s4, %s274_s11  ;;  %p278_p11 = scmp.lt.u32.totalorder %s274_s11, %s479_s4 }
  0x38   :  { %p280_p12 = pnand %p278_p11, %p275_p10 }
  0x3a   :  { %283 = shalt.err (!%p280_p12)
}
  0x3b   :  { %s284_s16 = scalar_lea.vmem %s56_s23, 128  ;;  %p289_p0 = scmp.lt.s32.totalorder %s56_s23, %s56_s23 }
  0x3c   :  { %p285_p13 = scmp.ne.s32.totalorder %s56_s23, %s284_s16  ;;  %p290_p1 = scmp.lt.s32.totalorder %s284_s16, %s284_s16 }
  0x3e   :  { %p291_p2 = por %p290_p1, %p289_p0 }
  0x40   :  { %p292_p3 = pnand %p291_p2, %p285_p13 }
  0x42   :  { %295 = shalt.err (!%p292_p3)
}
  0x43   :  { %58 = dma.hbm_to_vmem [thread:$0]  %s479_s4, 128, %s56_s23, [#allocation11]  }
  0x44   :  { %340 = dma.done.wait [#allocation5], 128  }
  0x45   :  { %341 = vsyncadd [#allocation5], 4294967168 }
  0x46   :  { %342 = dma.done.wait [#allocation8], 256  }
  0x47   :  { %343 = vsyncadd [#allocation8], 4294967040 }
  0x48   :  { %344 = dma.done.wait [#allocation11], 128  }
  0x49   :  { %345 = vsyncadd [#allocation11], 4294967168  ;;  %vm75_vm0 = vcmask 261120   ;;  %v354_v0 = vmov 0.0   ;;  %v79_v1 = vld [vmem:[#allocation4] sm:$0xff]  ;;  %v98_v3 = vld [vmem:[#allocation9] sm:$0xff] }
  0x4a   :  { %76 = vst.msk [vmem:[#allocation2] sm:$0xff] %vm75_vm0, %v354_v0  ;;  %77 = vst.msk [vmem:[#allocation3] sm:$0xff] %vm75_vm0, %v354_v0  ;;  %v84_v2 = vand.u32 2147483647, %v79_v1  ;;  %v78_v4 = vld [vmem:[#allocation10] sm:$0xff]  ;;  %v80_v18 = vld [vmem:[#allocation7] sm:$0xff] }
  0x4b   :  { %v103_v5 = vand.u32 2147483647, %v98_v3  ;;  %v99_v19 = vld [vmem:[%s478_s3] sm:$0xff]  ;;  %v81_v21 = vmax.f32 %v79_v1, 0.0  ;;  %v82_v22 = vmul.f32 %v80_v18, %v79_v1  ;;  %v100_v25 = vmax.f32 %v98_v3, 0.0  ;;  %s355_s3 = smov [#allocation12]  }
  0x4c   :  { %v85_v7 = vsub.f32 0.0, %v84_v2  ;;  %v101_v26 = vmul.f32 %v99_v19, %v98_v3  ;;  %s164_s1 = sshll.u32 %s355_s3, 4  ;;  %vm143_vm3 = vcmask 0   ;;  %s356_s20 = smov [#allocation13]   ;;  %s165_s1 = int_to_ptr.vmem [resolvable:$true] %s164_s1 }
  0x4d   :  { %v104_v9 = vsub.f32 0.0, %v103_v5  ;;  %v83_v30 = vsub.f32 %v81_v21, %v82_v22  ;;  %s174_s21 = sshll.u32 %s356_s20, 4  ;;  %s296_s22 = scalar_lea.vmem %s165_s1, 16  ;;  %s175_s21 = int_to_ptr.vmem [resolvable:$true] %s174_s21 }
  0x4e   :  { %v86_v10 = vmul.f32 1.442695, %v85_v7  ;;  %v102_v34 = vsub.f32 %v100_v25, %v101_v26  ;;  %p297_p4 = scmp.ne.s32.totalorder %s165_s1, %s296_s22  ;;  %s300_s23 = scalar_lea.vmem %s165_s1, 32 }
  0x4f   :  { %v105_v11 = vmul.f32 1.442695, %v104_v9  ;;  %p301_p5 = scmp.lt.s32.totalorder %s165_s1, %s165_s1  ;;  %p302_p6 = scmp.lt.s32.totalorder %s300_s23, %s296_s22 }
  0x50   :  { %200 = vpow2.f32 %v86_v10 }
  0x51   :  { %v124_v6 = vld [vmem:[#allocation3] sm:$0xff]  ;;  %202 = vpow2.f32 %v105_v11  ;;  %v119_v41 = vld [vmem:[#allocation2] sm:$0xff]  ;;  %p303_p7 = por %p302_p6, %p301_p5 }
  0x52   :  { %v126_v8 = vadd.f32 %v124_v6, %v78_v4 }
  0x53   :  { %p304_p8 = pnand %p303_p7, %p297_p4 }
  0x54   :  { %127 = vst.msk [vmem:[#allocation3] sm:$0xff] %vm75_vm0, %v126_v8 }
  0x5a   :  { %v201_v12 = vpop.eup %200 }
  0x5b   :  { %v203_v13 = vpop.eup %202  ;;  %v88_v14 = vadd.f32 1.0, %v201_v12  ;;  %v91_v16 = vmul.f32 -0.5, %v201_v12  ;;  %v94_v23 = vand.u32 2147483647, %v201_v12  ;;  %v145_v45 = vld [vmem:[#allocation3] sm:$0xff] }
  0x5c   :  { %v107_v15 = vadd.f32 1.0, %v203_v13  ;;  %v110_v17 = vmul.f32 -0.5, %v203_v13  ;;  %v113_v27 = vand.u32 2147483647, %v203_v13  ;;  %v146_v47 = vsel %vm75_vm0, %v145_v45, 0.0 }
  0x5d   :  { %204 = vlog2.f32 %v88_v14  ;;  %v92_v20 = vadd.f32 1.0, %v91_v16  ;;  %vm95_vm1 = vcmp.lt.f32.partialorder %v94_v23, 0.0004427343 }
  0x5e   :  { %206 = vlog2.f32 %v107_v15  ;;  %v111_v24 = vadd.f32 1.0, %v110_v17  ;;  %vm114_vm2 = vcmp.lt.f32.partialorder %v113_v27, 0.0004427343 }
  0x5f   :  { %v93_v28 = vmul.f32 %v201_v12, %v92_v20 }
  0x60   :  { %v112_v31 = vmul.f32 %v203_v13, %v111_v24 }
  0x67   :  { %v205_v29 = vpop.eup %204 }
  0x68   :  { %v207_v32 = vpop.eup %206  ;;  %v90_v33 = vmul.f32 0.6931472, %v205_v29 }
  0x69   :  { %v109_v35 = vmul.f32 0.6931472, %v207_v32 }
  0x6a   :  { %v96_v36 = vsel %vm95_vm1, %v93_v28, %v90_v33 }
  0x6b   :  { %v97_v37 = vadd.f32 %v96_v36, %v83_v30  ;;  %v115_v38 = vsel %vm114_vm2, %v112_v31, %v109_v35 }
  0x6c   :  { %v116_v39 = vadd.f32 %v115_v38, %v102_v34 }
  0x6e   :  { %v117_v40 = vadd.f32 %v116_v39, %v97_v37 }
  0x70   :  { %v118_v42 = vmul.f32 %v117_v40, %v78_v4 }
  0x72   :  { %v121_v43 = vadd.f32 %v119_v41, %v118_v42 }
  0x74   :  { %123 = vst.msk [vmem:[#allocation2] sm:$0xff] %vm75_vm0, %v121_v43 }
  0x7b   :  { %v131_v44 = vld [vmem:[#allocation2] sm:$0xff] }
  0x7c   :  { %v132_v46 = vsel %vm75_vm0, %v131_v44, 0.0 }
  0x7d   :  { %133 = vadd.xlane.f32.xlu0 %v132_v46 }
  0x81   :  { %147 = vadd.xlane.f32.xlu0 %v146_v47 }
 0x10a   :  { %v134_v48 = vpop.xlane.xlu0 %133 }
 0x10b   :  { %v135_v49 = vrot.slane %v134_v48, 4 }
 0x10d   :  { %v136_v50 = vadd.f32 %v135_v49, %v134_v48 }
 0x10e   :  { %v148_v51 = vpop.xlane.xlu0 %147 }
 0x10f   :  { %v137_v52 = vrot.slane %v136_v50, 2  ;;  %v149_v53 = vrot.slane %v148_v51, 4 }
 0x111   :  { %v150_v54 = vadd.f32 %v149_v53, %v148_v51  ;;  %v138_v55 = vadd.f32 %v137_v52, %v136_v50 }
 0x113   :  { %v151_v56 = vrot.slane %v150_v54, 2  ;;  %v139_v57 = vrot.slane %v138_v55, 1 }
 0x115   :  { %v152_v58 = vadd.f32 %v151_v56, %v150_v54  ;;  %v140_v59 = vadd.f32 %v139_v57, %v138_v55 }
 0x117   :  { %189 = vpush %v140_v59  ;;  %v153_v60 = vrot.slane %v152_v58, 1 }
 0x119   :  { %v154_v61 = vadd.f32 %v153_v60, %v152_v58 }
 0x11b   :  { %191 = vpush %v154_v61 }
 0x148   :  { %s190_s19 = spop %189 }
 0x149   :  { %v142_v62 = vstv %s190_s19 }
 0x14a   :  { %144 = vst.msk [vmem:[#allocation12] sm:$0x1] %vm143_vm3, %v142_v62 }
 0x14b   :  { %307 = shalt.err (!%p304_p8)
}
 0x14c   :  { %s308_s27 = scalar_lea.hbm %s480_s5, 16 }
 0x14d   :  { %p309_p9 = scmp.ne.s32.totalorder %s480_s5, %s308_s27  ;;  %p312_p10 = scmp.lt.u32.totalorder %s308_s27, %s480_s5 }
 0x14f   :  { %p314_p11 = pnand %p312_p10, %p309_p9 }
 0x151   :  { %317 = shalt.err (!%p314_p11)
}
 0x152   :  { %167 = dma.vmem_to_hbm [thread:$0]  %s165_s1, 16, %s480_s5, [#allocation6]  }
 0x153   :  { %s192_s8 = spop %191  ;;  %s318_s9 = scalar_lea.vmem %s175_s21, 16 }
 0x154   :  { %v156_v63 = vstv %s192_s8  ;;  %p319_p12 = scmp.ne.s32.totalorder %s175_s21, %s318_s9  ;;  %s322_s10 = scalar_lea.vmem %s175_s21, 32 }
 0x155   :  { %157 = vst.msk [vmem:[#allocation13] sm:$0x1] %vm143_vm3, %v156_v63  ;;  %p323_p13 = scmp.lt.s32.totalorder %s175_s21, %s175_s21  ;;  %p324_p0 = scmp.lt.s32.totalorder %s322_s10, %s318_s9 }
 0x157   :  { %p325_p1 = por %p324_p0, %p323_p13 }
 0x159   :  { %p326_p2 = pnand %p325_p1, %p319_p12 }
 0x15b   :  { %329 = shalt.err (!%p326_p2)
}
 0x15c   :  { %s330_s13 = scalar_lea.hbm %s481_s6, 16 }
 0x15d   :  { %p331_p3 = scmp.ne.s32.totalorder %s481_s6, %s330_s13  ;;  %p334_p4 = scmp.lt.u32.totalorder %s330_s13, %s481_s6 }
 0x15f   :  { %p336_p5 = pnand %p334_p4, %p331_p3 }
 0x161   :  { %339 = shalt.err (!%p336_p5)
}
 0x162   :  { %177 = dma.vmem_to_hbm [thread:$0]  %s175_s21, 16, %s481_s6, [#allocation14]  }
 0x163   :  { %346 = dma.done.wait [#allocation6], 16  }
 0x164   :  { %347 = vsyncadd [#allocation6], 4294967280 }
 0x165   :  { %348 = dma.done.wait [#allocation14], 16  }
 0x166   :  { %349 = vsyncadd [#allocation14], 4294967280 }
 0x167   :  { %184 = vsyncpa [#allocation5], 1 }
 0x168   :  { %185 = vsyncpa [#allocation8], 1 }
 0x169   :  { %186 = vsyncpa [#allocation11], 1 }
 0x16a   :  { %187 = vsyncpa [#allocation6], 1 }
 0x16b   :  { %188 = vsyncpa [#allocation14], 1 }

</bundles_post_ra>
